<compile_context>
chip_gen: v7x
topology: tpu7x:2x2x1
jax: 0.10.0
libtpu: 0.0.40
codegen_flags: <defaults>
</compile_context>

<pallas_src>
import math
from functools import partial

import jax
import jax.numpy as jnp
from jax.experimental import pallas as pl
from jax.experimental.pallas import tpu as pltpu

NEG = -1e9        # large finite negative used for masking (safe to stack)
LN_EPS = 1e-5     # PyTorch LayerNorm default


# ------------------------------ tiling helpers ------------------------------
def _round_up(x, m):
    return ((x + m - 1) // m) * m


def _row_tile(M, block_rows):
    """Largest multiple-of-8 tile <= block_rows dividing M (M is a multiple of 8)."""
    t = min(block_rows, M)
    t -= t % 8
    while t > 8 and M % t:
        t -= 8
    return max(t, 8)


def _col_tile(Nout, block_cols):
    """Full width if it fits, else the largest multiple-of-128 divisor <= block_cols."""
    if Nout <= block_cols:
        return Nout
    t = block_cols - block_cols % 128
    while t > 128 and Nout % t:
        t -= 128
    return t if (t >= 128 and Nout % t == 0) else Nout


def _mosaic_params(sems, block_bytes):
    # Explicit VMEM limit: ~double-buffered blocks + margin, clamped.  Addresses the
    # 16 MiB scoped default on v5e while leaving big tiles possible on v6e.
    vmem = int(min(max(3 * block_bytes + (4 << 20), 16 << 20), 100 << 20))
    return pltpu.CompilerParams(dimension_semantics=sems, vmem_limit_bytes=vmem)


# ------------------------------ Pallas kernels ------------------------------
def _linear_kernel(x_ref, w_ref, b_ref, o_ref):
    # o = x @ W + b      (bf16 operands, f32 accumulate, bf16 store)
    y = jnp.dot(x_ref[...], w_ref[...], preferred_element_type=jnp.float32) + b_ref[...]
    o_ref[...] = y.astype(o_ref.dtype)


def _proj_add_ln_kernel(a_ref, r_ref, w_ref, b_ref, g_ref, beta_ref, o_ref):
    # o = LayerNorm(r + a @ Wo + bo)     (post-norm residual; LN math in f32)
    y = jnp.dot(a_ref[...], w_ref[...], preferred_element_type=jnp.float32) + b_ref[...]
    x = r_ref[...].astype(jnp.float32) + y
    mu = jnp.mean(x, axis=-1, keepdims=True)
    var = jnp.mean((x - mu) ** 2, axis=-1, keepdims=True)
    o_ref[...] = ((x - mu) * jax.lax.rsqrt(var + LN_EPS) * g_ref[...]
                  + beta_ref[...]).astype(o_ref.dtype)


def _ffn_add_ln_kernel(x_ref, w1_ref, b1_ref, w2_ref, b2_ref, g_ref, beta_ref, o_ref):
    # o = LayerNorm(x + relu(x @ W1 + b1) @ W2 + b2)
    x = x_ref[...]
    h = jnp.dot(x, w1_ref[...], preferred_element_type=jnp.float32) + b1_ref[...]
    h = jnp.maximum(h, 0.0)
    y = jnp.dot(h.astype(jnp.bfloat16), w2_ref[...],
                preferred_element_type=jnp.float32) + b2_ref[...]
    z = x.astype(jnp.float32) + y
    mu = jnp.mean(z, axis=-1, keepdims=True)
    var = jnp.mean((z - mu) ** 2, axis=-1, keepdims=True)
    o_ref[...] = ((z - mu) * jax.lax.rsqrt(var + LN_EPS) * g_ref[...]
                  + beta_ref[...]).astype(o_ref.dtype)


def _ln_kernel(x_ref, g_ref, b_ref, o_ref):
    x = x_ref[...].astype(jnp.float32)
    mu = jnp.mean(x, axis=-1, keepdims=True)
    var = jnp.mean((x - mu) ** 2, axis=-1, keepdims=True)
    o_ref[...] = ((x - mu) * jax.lax.rsqrt(var + LN_EPS) * g_ref[...]
                  + b_ref[...]).astype(o_ref.dtype)


def _sdpa_head(q, k, v, mask):
    # q,k,v: bf16 (Lq,Dh)/(Lk,Dh); mask: f32 additive, broadcastable to (Lq,Lk).
    s = jax.lax.dot_general(q, k, (((1,), (1,)), ((), ())),
                            preferred_element_type=jnp.float32)      # q @ k^T
    s = s + mask
    s = s - jnp.max(s, axis=-1, keepdims=True)
    p = jnp.exp(s)
    p = p * pl.reciprocal(jnp.sum(p, axis=-1, keepdims=True), approx=True)  # EUP slot
    return jnp.dot(p.astype(jnp.bfloat16), v, preferred_element_type=jnp.float32)


def _self_attn_kernel(qkv_ref, am_ref, kp_ref, o_ref, *, nhead, dh):
    # one batch element; fused (L, 3E) QKV slab; lane-dense (L, E) output store.
    E = nhead * dh
    qkv = qkv_ref[0]                                  # (L, 3E) bf16
    mask = am_ref[...] + kp_ref[0]                    # (Lq,Lk) + (1,Lk) additive f32
    outs = []
    for h in range(nhead):                            # static unroll over heads
        q = qkv[:, h * dh:(h + 1) * dh]               # 1/sqrt(dh) folded into Wq/bq
        k = qkv[:, E + h * dh:E + (h + 1) * dh]
        v = qkv[:, 2 * E + h * dh:2 * E + (h + 1) * dh]
        outs.append(_sdpa_head(q, k, v, mask))
    o_ref[0] = jnp.concatenate(outs, axis=-1).astype(o_ref.dtype)


def _cross_attn_kernel(q_ref, kv_ref, kp_ref, o_ref, *, nhead, dh):
    E = nhead * dh
    q = q_ref[0]                                      # (Lq, E)  bf16
    kv = kv_ref[0]                                    # (Lk, 2E) bf16
    mask = kp_ref[0]                                  # (1, Lk)  additive f32
    outs = []
    for h in range(nhead):
        qh = q[:, h * dh:(h + 1) * dh]
        k = kv[:, h * dh:(h + 1) * dh]
        v = kv[:, E + h * dh:E + (h + 1) * dh]
        outs.append(_sdpa_head(qh, k, v, mask))
    o_ref[0] = jnp.concatenate(outs, axis=-1).astype(o_ref.dtype)


# ------------------------------- op wrappers -------------------------------
def linear(x2, w, b, *, block_rows=256, block_cols=512, use_pallas=True):
    """y = x @ W + b  (bf16 in / f32 acc / bf16 out); rows and output lanes tiled."""
    M, K = x2.shape
    Nout = w.shape[1]
    if not use_pallas:
        return (jnp.dot(x2, w, preferred_element_type=jnp.float32) + b).astype(jnp.bfloat16)
    TM = _row_tile(M, block_rows)
    TN = _col_tile(Nout, block_cols)
    blk = TM * K * 2 + K * TN * 2 + TN * 4 + TM * TN * 2
    return pl.pallas_call(
        _linear_kernel,
        out_shape=jax.ShapeDtypeStruct((M, Nout), jnp.bfloat16),
        grid=(M // TM, Nout // TN),
        in_specs=[pl.BlockSpec((TM, K), lambda i, j: (i, 0)),
                  pl.BlockSpec((K, TN), lambda i, j: (0, j)),
                  pl.BlockSpec((1, TN), lambda i, j: (0, j))],
        out_specs=pl.BlockSpec((TM, TN), lambda i, j: (i, j)),
        compiler_params=_mosaic_params(("parallel", "parallel"), blk),
    )(x2, w, b)


def proj_add_ln(a2, r2, w, b, g, beta, *, block_rows=256, use_pallas=True):
    """LayerNorm(r + a @ Wo + bo), fused; rows tiled, Wo VMEM-resident."""
    M, E = r2.shape
    if not use_pallas:
        y = jnp.dot(a2, w, preferred_element_type=jnp.float32) + b
        x = r2.astype(jnp.float32) + y
        mu = jnp.mean(x, -1, keepdims=True)
        var = jnp.mean((x - mu) ** 2, -1, keepdims=True)
        return ((x - mu) * jax.lax.rsqrt(var + LN_EPS) * g + beta).astype(jnp.bfloat16)
    TM = _row_tile(M, block_rows)
    blk = 3 * TM * E * 2 + E * E * 2 + 3 * E * 4
    return pl.pallas_call(
        _proj_add_ln_kernel,
        out_shape=jax.ShapeDtypeStruct((M, E), jnp.bfloat16),
        grid=(M // TM,),
        in_specs=[pl.BlockSpec((TM, E), lambda i: (i, 0)),
                  pl.BlockSpec((TM, E), lambda i: (i, 0)),
                  pl.BlockSpec((E, E), lambda i: (0, 0)),
                  pl.BlockSpec((1, E), lambda i: (0, 0)),
                  pl.BlockSpec((1, E), lambda i: (0, 0)),
                  pl.BlockSpec((1, E), lambda i: (0, 0))],
        out_specs=pl.BlockSpec((TM, E), lambda i: (i, 0)),
        compiler_params=_mosaic_params(("parallel",), blk),
    )(a2, r2, w, b, g, beta)


def ffn_add_ln(x2, w1, b1, w2, b2, g, beta, *, block_rows=256, use_pallas=True):
    """LayerNorm(x + relu(x@W1+b1)@W2+b2), fused; rows tiled, W1/W2 VMEM-resident."""
    M, E = x2.shape
    F = w1.shape[1]
    if not use_pallas:
        h = jnp.dot(x2, w1, preferred_element_type=jnp.float32) + b1
        h = jnp.maximum(h, 0.0)
        y = jnp.dot(h.astype(jnp.bfloat16), w2, preferred_element_type=jnp.float32) + b2
        z = x2.astype(jnp.float32) + y
        mu = jnp.mean(z, -1, keepdims=True)
        var = jnp.mean((z - mu) ** 2, -1, keepdims=True)
        return ((z - mu) * jax.lax.rsqrt(var + LN_EPS) * g + beta).astype(jnp.bfloat16)
    TM = _row_tile(M, block_rows)
    blk = 2 * TM * E * 2 + 2 * E * F * 2 + (F + 3 * E) * 4 + TM * F * 4
    return pl.pallas_call(
        _ffn_add_ln_kernel,
        out_shape=jax.ShapeDtypeStruct((M, E), jnp.bfloat16),
        grid=(M // TM,),
        in_specs=[pl.BlockSpec((TM, E), lambda i: (i, 0)),
                  pl.BlockSpec((E, F), lambda i: (0, 0)),
                  pl.BlockSpec((1, F), lambda i: (0, 0)),
                  pl.BlockSpec((F, E), lambda i: (0, 0)),
                  pl.BlockSpec((1, E), lambda i: (0, 0)),
                  pl.BlockSpec((1, E), lambda i: (0, 0)),
                  pl.BlockSpec((1, E), lambda i: (0, 0))],
        out_specs=pl.BlockSpec((TM, E), lambda i: (i, 0)),
        compiler_params=_mosaic_params(("parallel",), blk),
    )(x2, w1, b1, w2, b2, g, beta)


def layer_norm(x2, g, beta, *, block_rows=256, use_pallas=True):
    M, E = x2.shape
    if not use_pallas:
        x = x2.astype(jnp.float32)
        mu = jnp.mean(x, -1, keepdims=True)
        var = jnp.mean((x - mu) ** 2, -1, keepdims=True)
        return ((x - mu) * jax.lax.rsqrt(var + LN_EPS) * g + beta).astype(jnp.bfloat16)
    TM = _row_tile(M, block_rows)
    blk = 2 * TM * E * 2 + 2 * E * 4
    return pl.pallas_call(
        _ln_kernel,
        out_shape=jax.ShapeDtypeStruct((M, E), jnp.bfloat16),
        grid=(M // TM,),
        in_specs=[pl.BlockSpec((TM, E), lambda i: (i, 0)),
                  pl.BlockSpec((1, E), lambda i: (0, 0)),
                  pl.BlockSpec((1, E), lambda i: (0, 0))],
        out_specs=pl.BlockSpec((TM, E), lambda i: (i, 0)),
        compiler_params=_mosaic_params(("parallel",), blk),
    )(x2, g, beta)


def self_attention(qkv3, am, kp3, nhead, dh, use_pallas):
    """qkv3 (N,L,3E) bf16; am (L,L) f32; kp3 (N,1,L) f32 additive -> (N,L,E) bf16."""
    N, L, threeE = qkv3.shape
    E = nhead * dh
    if not use_pallas:
        q = qkv3[..., :E].reshape(N, L, nhead, dh)
        k = qkv3[..., E:2 * E].reshape(N, L, nhead, dh)
        v = qkv3[..., 2 * E:].reshape(N, L, nhead, dh)
        s = jnp.einsum('nqhd,nkhd->nhqk', q, k, preferred_element_type=jnp.float32)
        s = s + am[None, None] + kp3[:, None]
        s = s - jnp.max(s, -1, keepdims=True)
        p = jnp.exp(s)
        p = p / jnp.sum(p, -1, keepdims=True)
        o = jnp.einsum('nhqk,nkhd->nqhd', p.astype(jnp.bfloat16), v,
                       preferred_element_type=jnp.float32)
        return o.reshape(N, L, E).astype(jnp.bfloat16)
    blk = L * threeE * 2 + L * L * 4 + L * 4 + L * E * 2 + 2 * L * L * 4
    # TODO(synk): for long sequences on v7x, add an Lq grid axis and stream K/V blocks
    #             with an online-softmax accumulator instead of a full (Lq,Lk) score tile.
    return pl.pallas_call(
        partial(_self_attn_kernel, nhead=nhead, dh=dh),
        out_shape=jax.ShapeDtypeStruct((N, L, E), jnp.bfloat16),
        grid=(N,),
        in_specs=[pl.BlockSpec((1, L, threeE), lambda n: (n, 0, 0)),
                  pl.BlockSpec((L, L), lambda n: (0, 0)),
                  pl.BlockSpec((1, 1, L), lambda n: (n, 0, 0))],
        out_specs=pl.BlockSpec((1, L, E), lambda n: (n, 0, 0)),
        compiler_params=_mosaic_params(("parallel",), blk),
    )(qkv3, am, kp3)


def cross_attention(q3, kv3, kp3, nhead, dh, use_pallas):
    """q3 (N,Lq,E) bf16; kv3 (N,Lk,2E) bf16; kp3 (N,1,Lk) f32 -> (N,Lq,E) bf16."""
    N, Lq, E = q3.shape
    Lk = kv3.shape[1]
    if not use_pallas:
        q = q3.reshape(N, Lq, nhead, dh)
        k = kv3[..., :E].reshape(N, Lk, nhead, dh)
        v = kv3[..., E:].reshape(N, Lk, nhead, dh)
        s = jnp.einsum('nqhd,nkhd->nhqk', q, k, preferred_element_type=jnp.float32)
        s = s + kp3[:, None]
        s = s - jnp.max(s, -1, keepdims=True)
        p = jnp.exp(s)
        p = p / jnp.sum(p, -1, keepdims=True)
        o = jnp.einsum('nhqk,nkhd->nqhd', p.astype(jnp.bfloat16), v,
                       preferred_element_type=jnp.float32)
        return o.reshape(N, Lq, E).astype(jnp.bfloat16)
    blk = Lq * E * 2 + Lk * 2 * E * 2 + Lk * 4 + Lq * E * 2 + 2 * Lq * Lk * 4
    return pl.pallas_call(
        partial(_cross_attn_kernel, nhead=nhead, dh=dh),
        out_shape=jax.ShapeDtypeStruct((N, Lq, E), jnp.bfloat16),
        grid=(N,),
        in_specs=[pl.BlockSpec((1, Lq, E), lambda n: (n, 0, 0)),
                  pl.BlockSpec((1, Lk, 2 * E), lambda n: (n, 0, 0)),
                  pl.BlockSpec((1, 1, Lk), lambda n: (n, 0, 0))],
        out_specs=pl.BlockSpec((1, Lq, E), lambda n: (n, 0, 0)),
        compiler_params=_mosaic_params(("parallel",), blk),
    )(q3, kv3, kp3)


# ------------------------------- model glue -------------------------------
def self_attn_sublayer(x2, N, L, am, kp3, p, pre, ln_g, ln_b, H, Dh, block_rows, use_pallas):
    E = H * Dh
    qkv = linear(x2, p[pre + 'qkv_w'], p[pre + 'qkv_b'],
                 block_rows=block_rows, use_pallas=use_pallas)            # (N*L, 3E)
    o = self_attention(qkv.reshape(N, L, 3 * E), am, kp3, H, Dh, use_pallas)
    return proj_add_ln(o.reshape(N * L, E), x2, p[pre + 'wo'], p[pre + 'bo'],
                       ln_g, ln_b, block_rows=block_rows, use_pallas=use_pallas)


def cross_attn_sublayer(y2, mem2, N, Lq, Lk, kp3, p, pre, ln_g, ln_b, H, Dh,
                        block_rows, use_pallas):
    E = H * Dh
    q = linear(y2, p[pre + 'q_w'], p[pre + 'q_b'],
               block_rows=block_rows, use_pallas=use_pallas)              # (N*Lq, E)
    kv = linear(mem2, p[pre + 'kv_w'], p[pre + 'kv_b'],
                block_rows=block_rows, use_pallas=use_pallas)             # (N*Lk, 2E)
    o = cross_attention(q.reshape(N, Lq, E), kv.reshape(N, Lk, 2 * E), kp3, H, Dh, use_pallas)
    return proj_add_ln(o.reshape(N * Lq, E), y2, p[pre + 'wo'], p[pre + 'bo'],
                       ln_g, ln_b, block_rows=block_rows, use_pallas=use_pallas)


def ffn_sublayer(x2, p, pre, ln_pre, block_rows, use_pallas):
    return ffn_add_ln(x2, p[pre + 'w1'], p[pre + 'b1'], p[pre + 'w2'], p[pre + 'b2'],
                      p[ln_pre + '_g'], p[ln_pre + '_b'],
                      block_rows=block_rows, use_pallas=use_pallas)


def positional_encoding(d_model, max_len=5000):
    pos = jnp.arange(max_len, dtype=jnp.float32)[:, None]
    div = jnp.exp(jnp.arange(0, d_model, 2, dtype=jnp.float32)
                  * (-math.log(10000.0) / d_model))
    pe = jnp.zeros((max_len, d_model), jnp.float32)
    pe = pe.at[:, 0::2].set(jnp.sin(pos * div))
    pe = pe.at[:, 1::2].set(jnp.cos(pos * div))
    return pe                                                             # (max_len, E)


def init_params(key, cfg):
    """Builds inference-ready params: bf16 weights, fused QKV/KV, 1/sqrt(Dh) folded into Q."""
    E, F, H = cfg['emb_size'], cfg['dim_feedforward'], cfg['nhead']
    Dh = E // H
    sq = 1.0 / math.sqrt(Dh)
    Vs, Vt = cfg['src_vocab'], cfg['tgt_vocab']
    keys = iter(jax.random.split(key, 512))

    def w(shape, s=0.02):
        return jax.random.normal(next(keys), shape, jnp.float32) * s

    p = {}
    p['src_emb'] = w((Vs, E), 1.0 / math.sqrt(E))
    p['tgt_emb'] = w((Vt, E), 1.0 / math.sqrt(E))

    def mha(pre, fused_qkv):
        wq, wk, wv = w((E, E)) * sq, w((E, E)), w((E, E))   # (in, out) == PyTorch W^T
        bq, bk, bv = w((E,)) * sq, w((E,)), w((E,))
        if fused_qkv:
            p[pre + 'qkv_w'] = jnp.concatenate([wq, wk, wv], 1).astype(jnp.bfloat16)
            p[pre + 'qkv_b'] = jnp.concatenate([bq, bk, bv]).reshape(1, 3 * E)
        else:
            p[pre + 'q_w'] = wq.astype(jnp.bfloat16)
            p[pre + 'q_b'] = bq.reshape(1, E)
            p[pre + 'kv_w'] = jnp.concatenate([wk, wv], 1).astype(jnp.bfloat16)
            p[pre + 'kv_b'] = jnp.concatenate([bk, bv]).reshape(1, 2 * E)
        p[pre + 'wo'] = w((E, E)).astype(jnp.bfloat16)
        p[pre + 'bo'] = w((E,)).reshape(1, E)

    def ln(pre):
        p[pre + '_g'] = jnp.ones((1, E), jnp.float32)
        p[pre + '_b'] = jnp.zeros((1, E), jnp.float32)

    def ffn(pre):
        p[pre + 'w1'] = w((E, F)).astype(jnp.bfloat16)
        p[pre + 'b1'] = w((F,)).reshape(1, F)
        p[pre + 'w2'] = w((F, E)).astype(jnp.bfloat16)
        p[pre + 'b2'] = w((E,)).reshape(1, E)

    for l in range(cfg['num_encoder_layers']):
        pre = f'enc{l}_'
        mha(pre + 'sa_', True); ln(pre + 'ln1')
        ffn(pre + 'ff_'); ln(pre + 'ln2')
    ln('enc_norm')
    for l in range(cfg['num_decoder_layers']):
        pre = f'dec{l}_'
        mha(pre + 'sa_', True); ln(pre + 'ln1')
        mha(pre + 'ca_', False); ln(pre + 'ln2')
        ffn(pre + 'ff_'); ln(pre + 'ln3')
    ln('dec_norm')

    Vp = _round_up(Vt, 128)        # lane-pad the vocab ONCE here, not per forward
    p['gen_w'] = jnp.pad(w((E, Vt)), ((0, 0), (0, Vp - Vt))).astype(jnp.bfloat16)
    p['gen_b'] = jnp.pad(w((Vt,)), (0, Vp - Vt)).reshape(1, Vp)
    return p


def forward(p, cfg, src, trg, src_mask, tgt_mask, src_padding_mask, tgt_padding_mask,
            memory_key_padding_mask, use_pallas=True, block_rows=256, block_cols=512):
    E, H = cfg['emb_size'], cfg['nhead']
    Dh = E // H
    S, N = src.shape
    T, _ = trg.shape
    Vt = cfg['tgt_vocab']
    pe = cfg['pe']

    # Pad sequence axes once to sublane multiples; padded tokens are masked as keys and
    # padded query rows are sliced away at the very end (no per-kernel pad/slice copies).
    Sp, Tp = _round_up(S, 8), _round_up(T, 8)
    src_p = jnp.pad(src, ((0, Sp - S), (0, 0)))
    trg_p = jnp.pad(trg, ((0, Tp - T), (0, 0)))

    # Batch-first internal layout (N, L, E): no head/batch transposes anywhere.
    # Token embedding gather + PE add stay plain JAX; dropout = identity (inference).
    src_x = (p['src_emb'][src_p.T] + pe[:Sp][None]).astype(jnp.bfloat16).reshape(N * Sp, E)
    tgt_x = (p['tgt_emb'][trg_p.T] + pe[:Tp][None]).astype(jnp.bfloat16).reshape(N * Tp, E)

    # Small mask prep (never materializes (N, Lq, Lk)).
    def pad_am(m, L, Lp):
        if m is None:
            return jnp.zeros((Lp, Lp), jnp.float32)
        return jnp.pad(m.astype(jnp.float32), ((0, Lp - L), (0, Lp - L)))

    def pad_kp(m, L, Lp):
        if m is None:
            m = jnp.zeros((N, L), jnp.bool_)
        m = jnp.pad(m, ((0, 0), (0, Lp - L)), constant_values=True)
        return jnp.where(m, NEG, 0.0).astype(jnp.float32).reshape(N, 1, Lp)

    src_am, tgt_am = pad_am(src_mask, S, Sp), pad_am(tgt_mask, T, Tp)
    src_kp, tgt_kp = pad_kp(src_padding_mask, S, Sp), pad_kp(tgt_padding_mask, T, Tp)
    mem_kp = pad_kp(memory_key_padding_mask, S, Sp)

    # ----- encoder stack (post-norm) -----
    x = src_x
    for l in range(cfg['num_encoder_layers']):
        pre = f'enc{l}_'
        x = self_attn_sublayer(x, N, Sp, src_am, src_kp, p, pre + 'sa_',
                               p[pre + 'ln1_g'], p[pre + 'ln1_b'], H, Dh,
                               block_rows, use_pallas)
        x = ffn_sublayer(x, p, pre + 'ff_', pre + 'ln2', block_rows, use_pallas)
    memory = layer_norm(x, p['enc_norm_g'], p['enc_norm_b'],
                        block_rows=block_rows, use_pallas=use_pallas)      # (N*Sp, E)

    # ----- decoder stack (post-norm) -----
    y = tgt_x
    for l in range(cfg['num_decoder_layers']):
        pre = f'dec{l}_'
        y = self_attn_sublayer(y, N, Tp, tgt_am, tgt_kp, p, pre + 'sa_',
                               p[pre + 'ln1_g'], p[pre + 'ln1_b'], H, Dh,
                               block_rows, use_pallas)
        y = cross_attn_sublayer(y, memory, N, Tp, Sp, mem_kp, p, pre + 'ca_',
                                p[pre + 'ln2_g'], p[pre + 'ln2_b'], H, Dh,
                                block_rows, use_pallas)
        y = ffn_sublayer(y, p, pre + 'ff_', pre + 'ln3', block_rows, use_pallas)
    outs = layer_norm(y, p['dec_norm_g'], p['dec_norm_b'],
                      block_rows=block_rows, use_pallas=use_pallas)        # (N*Tp, E)

    # generator (row + vocab-lane tiled; vocab pre-padded at init; bf16 logits)
    logits = linear(outs, p['gen_w'], p['gen_b'],
                    block_rows=block_rows, block_cols=block_cols, use_pallas=use_pallas)
    logits = logits.reshape(N, Tp, -1)[:, :T, :Vt]
    return logits.transpose(1, 0, 2).astype(jnp.float32)                  # (T, N, Vt)


if __name__ == "__main__":
    cfg = dict(num_encoder_layers=2, num_decoder_layers=2, emb_size=32, nhead=4,
               src_vocab=50, tgt_vocab=60, dim_feedforward=64)
    cfg['pe'] = positional_encoding(cfg['emb_size'], max_len=64)

    root = jax.random.PRNGKey(0)
    k_param, k_src, k_trg = jax.random.split(root, 3)
    params = init_params(k_param, cfg)

    S, T, N = 10, 8, 2
    src = jax.random.randint(k_src, (S, N), 0, cfg['src_vocab'], dtype=jnp.int32)
    trg = jax.random.randint(k_trg, (T, N), 0, cfg['tgt_vocab'], dtype=jnp.int32)

    src_mask = jnp.zeros((S, S), jnp.float32)                                   # no src masking
    tgt_mask = jnp.where(jnp.triu(jnp.ones((T, T), jnp.bool_), k=1), NEG, 0.0)  # causal
    tgt_mask = tgt_mask.astype(jnp.float32)
    src_padding_mask = jnp.zeros((N, S), jnp.bool_).at[:, -2:].set(True)
    tgt_padding_mask = jnp.zeros((N, T), jnp.bool_).at[1, -1].set(True)
    memory_key_padding_mask = src_padding_mask

    # block_rows=8 exercises the multi-step gridded/pipelined path at toy shapes;
    # use 256 (v7x/v5e) or 512 (v6e) at real sizes.
    out = forward(params, cfg, src, trg, src_mask, tgt_mask, src_padding_mask,
                  tgt_padding_mask, memory_key_padding_mask,
                  use_pallas=True, block_rows=8)
    out = jax.block_until_ready(out)

    # pure-JAX reference of the identical math (same bf16 storage / MXU casts)
    ref = forward(params, cfg, src, trg, src_mask, tgt_mask, src_padding_mask,
                  tgt_padding_mask, memory_key_padding_mask, use_pallas=False)
    ref = jax.block_until_ready(ref)

    assert out.shape == (T, N, cfg['tgt_vocab'])
    assert bool(jnp.all(jnp.isfinite(out)))
    assert bool(jnp.allclose(out, ref, atol=3e-2, rtol=3e-2))
    print("KERNEL_OK")
</pallas_src>

<mosaic_0001>
module attributes {stable_mosaic.version = 11 : i64} {
  func.func @_linear_kernel(%arg0: i32, %arg1: i32, %arg2: memref<8x32xbf16, #tpu.memory_space<vmem>>, %arg3: memref<32x96xbf16, #tpu.memory_space<vmem>>, %arg4: memref<1x96xf32, #tpu.memory_space<vmem>>, %arg5: memref<8x96xbf16, #tpu.memory_space<vmem>>) attributes {dimension_semantics = [#tpu.dimension_semantics<parallel>, #tpu.dimension_semantics<parallel>], iteration_bounds = array<i64: 4, 1>, scalar_prefetch = 0 : i64, scratch_operands = 0 : i64, tpu.core_type = #tpu.core_type<tc>, window_params = [{transform_indices = @transform_0, window_bounds = array<i64: 8, 32>}, {transform_indices = @transform_1, window_bounds = array<i64: 32, 96>}, {transform_indices = @transform_2, window_bounds = array<i64: 1, 96>}, {transform_indices = @transform_3, window_bounds = array<i64: 8, 96>}]} {
    %c0 = arith.constant 0 : index
    %c0_0 = arith.constant 0 : index
    %0 = vector.load %arg2[%c0, %c0_0] : memref<8x32xbf16, #tpu.memory_space<vmem>>, vector<8x32xbf16>
    %c0_1 = arith.constant 0 : index
    %c0_2 = arith.constant 0 : index
    %1 = vector.load %arg3[%c0_1, %c0_2] : memref<32x96xbf16, #tpu.memory_space<vmem>>, vector<32x96xbf16>
    %cst = arith.constant dense<0.000000e+00> : vector<8x96xf32>
    %2 = tpu.matmul %0, %1, %cst {dimension_numbers = #tpu.dot_dimension_numbers<[1], [0], [0], [1], [0, 0, 1, 1], [], []>} : vector<8x32xbf16>, vector<32x96xbf16>, vector<8x96xf32> -> vector<8x96xf32>
    %c0_3 = arith.constant 0 : index
    %c0_4 = arith.constant 0 : index
    %3 = vector.load %arg4[%c0_3, %c0_4] : memref<1x96xf32, #tpu.memory_space<vmem>>, vector<1x96xf32>
    %4 = vector.broadcast %3 : vector<1x96xf32> to vector<8x96xf32>
    %5 = arith.addf %2, %4 : vector<8x96xf32>
    %6 = arith.truncf %5 : vector<8x96xf32> to vector<8x96xbf16>
    %c0_5 = arith.constant 0 : index
    %c0_6 = arith.constant 0 : index
    %7 = vector.load %arg5[%c0_5, %c0_6] : memref<8x96xbf16, #tpu.memory_space<vmem>>, vector<8x96xbf16>
    tpu.vector_store %arg5[%c0_5, %c0_6], %6 {strides = array<i32>} : memref<8x96xbf16, #tpu.memory_space<vmem>>, vector<8x96xbf16>,
    return
  }
  func.func @transform_0(%arg0: i32, %arg1: i32) -> (i32, i32) {
    %c0_i32 = arith.constant 0 : i32
    %c0_i32_0 = arith.constant 0 : i32
    return %arg0, %c0_i32 : i32, i32
  }
  func.func @transform_1(%arg0: i32, %arg1: i32) -> (i32, i32) {
    %c0_i32 = arith.constant 0 : i32
    %c0_i32_0 = arith.constant 0 : i32
    return %c0_i32, %arg1 : i32, i32
  }
  func.func @transform_2(%arg0: i32, %arg1: i32) -> (i32, i32) {
    %c0_i32 = arith.constant 0 : i32
    %c0_i32_0 = arith.constant 0 : i32
    return %c0_i32, %arg1 : i32, i32
  }
  func.func @transform_3(%arg0: i32, %arg1: i32) -> (i32, i32) {
    %c0_i32 = arith.constant 0 : i32
    return %arg0, %arg1 : i32, i32
  }
}

</mosaic_0001>

<bundles_post_ra>
// kernel: tpu_custom_call.1
= control target key start
LH: loop header
LB: loop body
LE: loop exit
PB: predicated region body
PF: predicated region fallthrough
CT: control target
= control target key end

     0   :  { %8 = vsyncpa [#allocation3], 0  ;;  %s924_s0 = inlined_call_operand.hbm [shape: bf16[32,32], index: 0, kind: input, shape index: {}]   ;;  %s925_s1 = inlined_call_operand.hbm [shape: bf16[32,96], index: 1, kind: input, shape index: {}]   ;;  %s926_s2 = inlined_call_operand.vmem [shape: f32[1,96], index: 2, kind: input, shape index: {}]   ;;  %s927_s3 = inlined_call_operand.hbm [shape: bf16[32,96], index: 3, kind: output, shape index: {}]  }
   0x1   :  { %10 = vsyncpa [#allocation3 + $0x1], 0 }
   0x2   :  { %11 = vsyncpa [#allocation6], 0 }
   0x3   :  { %12 = vsyncpa [#allocation4], 0 }
   0x4   :  { %14 = vsyncpa [#allocation4 + $0x1], 0  ;;  %s709_s12 = smov 0   ;;  %s711_s13 = smov 0  }
   0x5   :  { %s713_s14 = smov 0   ;;  %s715_s15 = smov 0  }
   0x6   :  { %s717_s16 = smov 0   ;;  %s719_s17 = smov 0  }
   0x7 LB: > { %s426_s18 = sadd.s32 4294967295, %s680_s17   ;;  %s427_s19 = sadd.s32 4294967294, %s680_s17   ;;  %s680_s17 = sphi %s719_s17, %s20_s17   ;;  %s676_s16 = sphi %s717_s16, %s950_s16   ;;  %s672_s15 = sphi %s715_s15, %s949_s15   ;;  %s668_s14 = sphi %s713_s14, %s948_s14   ;;  %s664_s13 = sphi %s711_s13, %s947_s13   ;;  %s660_s12 = sphi %s709_s12, %s946_s12  }
   0x8   : > { %p52_p0 = scmp.ne.s32.totalorder %s664_s13, %s660_s12  ;;  %p743_p1 = scmp.eq.s32.totalorder %s426_s18, 0 }
   0x9   : > { %p747_p2 = scmp.eq.s32.totalorder %s426_s18, 3  ;;  %p136_p3 = scmp.eq.s32.totalorder %s427_s19, 3 }
   0xa   : > { %s932_s20 = scalar_select %p743_p1, 1, 0 }
   0xb   : > { %s933_s21 = scalar_select %p747_p2, 1, 0 }
   0xc   : > { %p753_p4 = por %p743_p1, %p52_p0  ;;  %p428_p5 = scmp.ge.s32.totalorder %s680_s17, 1 }
   0xd   : > { %p758_p6 = por %p136_p3, %p52_p0  ;;  %p143_p7 = scmp.lt.s32.totalorder %s680_s17, 5 }
   0xe   : > { %s934_s22 = scalar_select %p753_p4, 1, 0 }
   0xf   : > { %s935_s23 = scalar_select %p758_p6, 1, 0 }
  0x10   : > { %p763_p8 = pnand %p428_p5, %p143_p7  ;;  %s682_s25 = smov [#allocation5]  }
  0x11   : > { %s157_s26 = sshll.u32 %s682_s25, 4  ;;  %s32_s28 = sadd.s32 1, %s676_s16  ;;  %s158_s26 = int_to_ptr.vmem [resolvable:$true] %s157_s26 }
  0x12   : > { %s936_s24 = scalar_select %p763_p8, 1, 0 }
  0x13   : > { %p465_p9 = pneg %p763_p8  ;;  %s536_s4 = scalar_lea.hbm %s925_s1, 256 }
  0x14   : > { %p537_p11 = scmp.ne.s32.totalorder %s925_s1, %s536_s4  ;;  %p543_p3 = scmp.lt.u32.totalorder %s536_s4, %s925_s1 }
  0x15   : > { %p771_p10 = pnand %p465_p9, %p743_p1 }
  0x17   : > { %p538_p12 = pneg %p771_p10 }
  0x19   : > { %p539_p13 = pnand %p538_p12, %p537_p11 }
  0x1b   : > { %p540_p0 = pneg %p539_p13 }
  0x1d   : > { %p545_p5 = pnand %p543_p3, %p540_p0 }
  0x1f   : > { %548 = shalt.err (!%p545_p5)
}
  0x20   : > { %s549_s9 = scalar_lea.vmem %s158_s26, 256  ;;  %p557_p1 = scmp.lt.s32.totalorder %s158_s26, %s158_s26 }
  0x21   : > { %p550_p7 = scmp.ne.s32.totalorder %s158_s26, %s549_s9  ;;  %p558_p4 = scmp.lt.s32.totalorder %s549_s9, %s549_s9 }
  0x23   : > { %p552_p9 = pnand %p550_p7, %p538_p12  ;;  %p559_p8 = por %p558_p4, %p557_p1 }
  0x25   : > { %p553_p6 = pneg %p552_p9 }
  0x27   : > { %p560_p2 = pnand %p559_p8, %p553_p6 }
  0x29   : > { %563 = shalt.err (!%p560_p2)
}
  0x2a   : > { %s683_s10 = smov 64   ;;  %s684_s11 = smov 4  }
  0x2b   : > { %468 = dma.hbm_to_vmem [thread:$0]  (!%p771_p10), %s925_s1, 256, %s158_s26, [#allocation6], %s683_s10, %s683_s10, %s684_s11  }
  0x2c   : > { %p34_p1 = scmp.ge.s32.totalorder %s32_s28, 4  ;;  %s39_s25 = sadd.s32 1, %s668_s14 }
  0x2d   : > { %p46_p2 = scmp.ne.s32.totalorder %s668_s14, %s664_s13  ;;  %p47_p4 = scmp.eq.s32.totalorder %s680_s17, 0 }
  0x2e   : > { %s952_s28 = smov (%p34_p1, %s32_s28), 0  ;;  %p939_p8 = scmp.ne.s32.totalorder %s933_s21, 0 }
  0x2f   : > { %p798_p6 = por %p47_p4, %p46_p2  ;;  %s36_s27 = ssub.s32 %s676_s16, %s952_s28 }
  0x30   : > { %p804_p11 = por %p939_p8, %p46_p2  ;;  %p478_p12 = scmp.lt.s32.totalorder %s680_s17, 4 }
  0x31   : > { %p37_p10 = scmp.eq.s32.totalorder %s36_s27, 0  ;;  %s177_s26 = sand.u32 1, %s668_s14  }
  0x32   : > { %s432_s4 = sshll.u32 %s177_s26, 2  ;;  %s433_s6 = sshll.u32 %s676_s16, 6 }
  0x33   : > { %s813_s5 = scalar_select %p37_p10, %s668_s14, %s39_s25  }
  0x34   : > { %s819_s9 = scalar_lea.hbm %s924_s0, %s433_s6  ;;  %s181_s21 = scalar_lea.vmem [#allocation2], %s432_s4 }
  0x35   : > { %s188_s10 = sshll.u32 %s181_s21, 4  ;;  %p825_p13 = pnand %p478_p12, %p798_p6  ;;  %s821_s10 = int_to_ptr.vmem [resolvable:$true] %s188_s10 }
  0x36   : > { %s178_s18 = scalar_lea.sflag [#allocation3], %s177_s26  ;;  %s564_s19 = scalar_lea.hbm %s819_s9, 64 }
  0x37   : > { %p565_p0 = scmp.ne.s32.totalorder %s819_s9, %s564_s19  ;;  %p566_p3 = pneg %p825_p13 }
  0x38   : > { %s569_s4 = scalar_lea.hbm %s924_s0, 256  ;;  %p570_p9 = scmp.lt.u32.totalorder %s819_s9, %s924_s0 }
  0x39   : > { %p567_p5 = pnand %p566_p3, %p565_p0  ;;  %p571_p1 = scmp.lt.u32.totalorder %s569_s4, %s564_s19 }
  0x3a   : > { %p573_p4 = scmp.lt.u32.totalorder %s564_s19, %s819_s9 }
  0x3b   : > { %p568_p7 = pneg %p567_p5  ;;  %p572_p2 = por %p571_p1, %p570_p9 }
  0x3d   : > { %p574_p6 = por %p573_p4, %p572_p2 }
  0x3f   : > { %p575_p8 = pnand %p574_p6, %p568_p7 }
  0x41   : > { %578 = shalt.err (!%p575_p8)
}
  0x42   : > { %s579_s26 = scalar_lea.vmem %s821_s10, 64  ;;  %s685_s7 = smov [#allocation2]  }
  0x43   : > { %p580_p12 = scmp.ne.s32.totalorder %s821_s10, %s579_s26  ;;  %s584_s8 = sshll.u32 %s685_s7, 4  ;;  %s585_s8 = int_to_ptr.vmem [resolvable:$false] %s584_s8 }
  0x44   : > { %s586_s21 = scalar_lea.vmem %s585_s8, 128  ;;  %p587_p5 = scmp.lt.s32.totalorder %s821_s10, %s585_s8 }
  0x45   : > { %p582_p10 = pnand %p580_p12, %p566_p3  ;;  %p588_p9 = scmp.lt.s32.totalorder %s586_s21, %s579_s26 }
  0x47   : > { %p583_p0 = pneg %p582_p10  ;;  %p589_p1 = por %p588_p9, %p587_p5 }
  0x49   : > { %p590_p2 = pnand %p589_p1, %p583_p0 }
  0x4b   : > { %593 = shalt.err (!%p590_p2)
}
  0x4c   : > { %472 = dma.hbm_to_vmem [thread:$0]  (!%p825_p13), %s819_s9, 64, %s821_s10, %s178_s18  }
  0x4d   : > { %p942_p7 = scmp.ne.s32.totalorder %s936_s24, 0 }
  0x4e   : > { %s857_s19 = sand.u32 (!%p942_p7), 1, %s664_s13   ;;  %p943_p3 = scmp.ne.s32.totalorder (!%p942_p7), %s934_s22, 0 }
  0x4f   : > { %197 = sbr.rel (%p942_p7) target bundleno = 329 (0x149), region = 32  ;;  %s435_s25 = sshll.u32 (!%p942_p7), %s857_s19, 2 }
  0x50   : > { %s200_s27 = scalar_lea.sflag (!%p942_p7), [#allocation3], %s857_s19  ;;  %s203_s4 = scalar_lea.vmem (!%p942_p7), [#allocation2], %s435_s25 }
  0x56   : > { %647 = dma.done.wait (%p943_p3), %s200_s27, 64  }
  0x57   : > { %649 = vsyncadd (%p943_p3), %s200_s27, 4294967232  ;;  %p944_p4 = scmp.ne.s32.totalorder %s932_s20, 0 }
  0x59   : > { %651 = dma.done.wait (%p944_p4), [#allocation6], 256  }
  0x5a   : > { %653 = vsyncadd (%p944_p4), [#allocation6], 4294967040  ;;  %v686_v0 = vmov 0.0   ;;  %vm687_vm0 = vmmov 0   ;;  %v534_v1 = vld [vmem:[#allocation5] sm:$0xff]   ;;  %v535_v2 = vld [vmem:[#allocation5 + $0x8] sm:$0xff]  }
  0x5b   : > { %449 = vmatprep.subr.bf16.mxu0 %v686_v0  ;;  %453 = vmatprep.mubr.msk.bf16.mxu0 %vm687_vm0, %v686_v0  ;;  %v237_v3 = vld [vmem:[%s203_s4] sm:$0xf]  ;;  %vm261_vm1 = vcmask 261120   ;;  %s443_s20 = sshll.u32 %s672_s15, 6  ;;  %s232_s9 = scalar_lea.vmem [#allocation7], %s435_s25  ;;  %vm306_vm2 = vcmask 781312  }
  0x5c   : > { %450 = vmatpush3.bf16.msra.mxu0 %v534_v1  ;;  %v438_v4 = vld [vmem:[%s926_s2] ss:$0 sm:$0xff]  ;;  %s323_s10 = sshll.u32 %s232_s9, 4  ;;  %s876_s29 = scalar_lea.hbm %s927_s3, %s443_s20  ;;  %s878_s10 = int_to_ptr.vmem [resolvable:$true] %s323_s10 }
  0x5d   : > { %451 = vmatprep.subr.bf16.mxu0 %v686_v0  ;;  %s309_s15 = scalar_lea.sflag [#allocation4], %s857_s19  ;;  %s594_s6 = scalar_lea.vmem %s878_s10, 64 }
  0x5e   : > { %p595_p13 = scmp.ne.s32.totalorder %s878_s10, %s594_s6  ;;  %s688_s26 = smov [#allocation7]  }
  0x5f   : > { %s598_s7 = sshll.u32 %s688_s26, 4  ;;  %s599_s7 = int_to_ptr.vmem [resolvable:$false] %s598_s7 }
  0x60   : > { %452 = vmatpush3.bf16.msra.mxu0 %v535_v2  ;;  %p596_p6 = pnand %p595_p13, %p804_p11  ;;  %s600_s8 = scalar_lea.vmem %s599_s7, 128 }
  0x61   : > { %p601_p12 = scmp.lt.s32.totalorder %s878_s10, %s599_s7  ;;  %p602_p10 = scmp.lt.s32.totalorder %s600_s8, %s594_s6 }
  0x62   : > { %p597_p8 = pneg %p596_p6 }
  0x63   : > { %454 = vmatmul.mubr.msk.bf16.vlgmr.msra.gmra.mrb[0].mxu0 %vm261_vm1, %v237_v3  ;;  %p603_p0 = por %p602_p10, %p601_p12 }
  0x65   : > { %p604_p5 = pnand %p603_p0, %p597_p8 }
 0x136   : > { %v299_v5 = vpop.f32.mrb[0].mxu0 }
 0x137   : > { %v300_v6 = vadd.f32 %v438_v4, %v299_v5  ;;  %v455_v7 = vpop.f32.mrb[1].mxu0 }
 0x138   : > { %v302_v8 = vpop.f32.mrb[2].mxu0 }
 0x139   : > { %v305_v9 = vpack.c.bf16 %v300_v6, %v300_v6  ;;  %v456_v10 = vpop.f32.mrb[3].mxu0 }
 0x13b   : > { %307 = vst.msk [vmem:[%s232_s9] sm:$0xf] %vm306_vm2, %v305_v9 }
 0x13c   : > { %607 = shalt.err (!%p604_p5)
}
 0x13d   : > { %s608_s21 = scalar_lea.hbm %s876_s29, 64  ;;  %s612_s27 = scalar_lea.hbm %s927_s3, 256 }
 0x13e   : > { %p609_p9 = scmp.ne.s32.totalorder %s876_s29, %s608_s21  ;;  %p613_p7 = scmp.lt.u32.totalorder %s876_s29, %s927_s3 }
 0x13f   : > { %p614_p3 = scmp.lt.u32.totalorder %s612_s27, %s608_s21  ;;  %p616_p13 = scmp.lt.u32.totalorder %s608_s21, %s876_s29 }
 0x140   : > { %p610_p1 = pnand %p609_p9, %p804_p11 }
 0x141   : > { %p615_p4 = por %p614_p3, %p613_p7 }
 0x142   : > { %p611_p2 = pneg %p610_p1 }
 0x143   : > { %p617_p6 = por %p616_p13, %p615_p4 }
 0x145   : > { %p618_p8 = pnand %p617_p6, %p611_p2 }
 0x147   : > { %621 = shalt.err (!%p618_p8)
}
 0x148   : > { %463 = dma.vmem_to_hbm [thread:$0]  (%p804_p11), %s878_s10, 64, %s876_s29, %s309_s15  }
 0x149 PF: > { %p480_p12 = scmp.ge.s32.totalorder %s680_s17, 2  ;;  %s335_s24 = sand.u32 1, %s660_s12  }
 0x14a   : > { %p945_p10 = scmp.ne.s32.totalorder %s935_s23, 0  ;;  %s336_s20 = scalar_lea.sflag [#allocation4], %s335_s24 }
 0x14c   : > { %p474_p0 = pnand %p480_p12, %p945_p10 }
 0x14e   : > { %655 = dma.done.wait (!%p474_p0), %s336_s20, 64  }
 0x14f   : > { %657 = vsyncadd (!%p474_p0), %s336_s20, 4294967232  ;;  %s20_s17 = sadd.s32 1, %s680_s17   ;;  %s946_s12 = smov %s664_s13 }
 0x150   : > { %p17_p5 = scmp.ge.s32.totalorder %s20_s17, 6   ;;  %s947_s13 = smov %s668_s14 }
 0x151   : > { %s948_s14 = smov %s813_s5  ;;  %s949_s15 = smov %s676_s16 }
 0x152   : > { %s950_s16 = smov %s952_s28  ;;  %19 = sbr.rel (!%p17_p5) target bundleno = 7 (0x7), region = 85 }
 0x159   :  { %341 = vsyncpa [#allocation3], 1 }
 0x15a   :  { %343 = vsyncpa [#allocation3 + $0x1], 1 }
 0x15b   :  { %344 = vsyncpa [#allocation6], 1 }
 0x15c   :  { %345 = vsyncpa [#allocation4], 1 }
 0x15d   :  { %347 = vsyncpa [#allocation4 + $0x1], 1 }

</bundles_post_ra>
